<compile_context>
chip_gen: v7x
topology: tpu7x:2x2x1
jax: 0.10.0
libtpu: 0.0.40
codegen_flags: <defaults>
</compile_context>

<pallas_src>
import jax
import jax.numpy as jnp
from jax.experimental import pallas as pl
from jax.experimental.pallas import tpu as pltpu

# --- problem sizes (consistent with the module's __init__) -------------------
B = 2           # batch
L = 16          # input_size (max_vis_len)
E = 32          # embed_size
C = 4           # out_channels
HID = 32        # hidden_size
OUT = 8         # output_size
KS = (2, 3, 4)  # conv branch kernel heights

HP = L                       # padded per-channel conv length (16 >= L-k+1)
NCONV = 3 * C * HP           # 192  packed conv pre-activation width
NHID = 3 * HID               # 96   packed hidden width
NOUT = 3 * OUT               # 24   packed output width
NFC_ROWS = NCONV + NHID      # 288  rows of the stacked fc weight


# ------------------------------- kernel --------------------------------------
def global_attention_kernel(x_ref, wconv_ref, wfc_ref, aux_ref, out_ref):
    x = x_ref[...]                                            # (B, 512)

    # attention score: sigmoid(sum_{l,e} x*watt + batt), one reduction for all B
    watt = aux_ref[0:1, :]                                    # (1, 512)
    batt = aux_ref[4:5, 0:1]                                  # (1, 1)
    s = jnp.sum(x * watt, axis=1, keepdims=True) + batt       # (B, 1)
    score = 1.0 / (1.0 + jnp.exp(-s))                         # (B, 1)

    # all 3 conv branches / all taps / all channels in one matmul; score is a
    # per-row scalar so it commutes past the contraction.
    p = jnp.dot(x, wconv_ref[...], preferred_element_type=jnp.float32)   # (B, 192)
    bconv = aux_ref[1:2, 0:NCONV]                             # (1, 192)
    flat = jnp.tanh(score * p + bconv)                        # (B, 192)

    # block-diagonal fc1 (+ReLU); Dropout is identity in inference mode.
    w1 = wfc_ref[0:NCONV, :]                                  # (192, 96)
    b1 = aux_ref[2:3, 0:NHID]                                 # (1, 96)
    h = jnp.maximum(
        jnp.dot(flat, w1, preferred_element_type=jnp.float32) + b1, 0.0)  # (B, 96)

    # block-diagonal fc2, single lane-packed store.
    w2 = wfc_ref[NCONV:NFC_ROWS, 0:NOUT]                      # (96, 24)
    b2 = aux_ref[3:4, 0:NOUT]                                 # (1, 24)
    out_ref[...] = jnp.dot(h, w2, preferred_element_type=jnp.float32) + b2


# -------------------------- host-side weight packing -------------------------
def pack_params(params):
    """Pack the natural-layout params into (wconv, wfc, aux). Done once."""
    (watt, batt,
     wc2, bc2, w12, b12, w22, b22,
     wc3, bc3, w13, b13, w23, b23,
     wc4, bc4, w14, b14, w24, b24) = params
    branches = ((2, wc2, bc2, w12, b12, w22, b22),
                (3, wc3, bc3, w13, b13, w23, b23),
                (4, wc4, bc4, w14, b14, w24, b24))

    # Banded conv weight folding the tap shifts and the c-major flatten:
    #   wconv[l*E + e, i*C*HP + c*HP + h] = wc_k[l-h, c, e]  (0 <= l-h < k, h < H_k)
    l_idx = jnp.arange(L)[:, None]           # (L, 1)
    h_idx = jnp.arange(HP)[None, :]          # (1, HP)
    conv_blocks = []
    for br in branches:
        k, wc = br[0], br[1]                 # wc: (k, C, E)
        H = L - k + 1
        j_mat = l_idx - h_idx                                   # tap index per (l, h)
        valid = (j_mat >= 0) & (j_mat < k) & (h_idx < H)
        jc = jnp.clip(j_mat, 0, k - 1)
        wk = jnp.where(valid[:, :, None, None], wc[jc], 0.0)    # (L, HP, C, E)
        wk = wk.transpose(0, 3, 2, 1).reshape(L * E, C * HP)    # rows l*E+e, cols c*HP+h
        conv_blocks.append(wk)
    wconv = jnp.concatenate(conv_blocks, axis=1).astype(jnp.float32)     # (512, 192)

    # Block-diagonal fc1 (zero rows at padded h) stacked over block-diagonal fc2.
    wfc = jnp.zeros((NFC_ROWS, NHID), jnp.float32)
    for i, br in enumerate(branches):
        k, w1, w2 = br[0], br[3], br[5]      # w1: (C, H, HID), w2: (HID, OUT)
        H = L - k + 1
        blk = jnp.zeros((C, HP, HID), jnp.float32).at[:, :H, :].set(w1)
        wfc = wfc.at[i * C * HP:(i + 1) * C * HP,
                     i * HID:(i + 1) * HID].set(blk.reshape(C * HP, HID))
        wfc = wfc.at[NCONV + i * HID:NCONV + (i + 1) * HID,
                     i * OUT:(i + 1) * OUT].set(w2)

    # Aux row table: watt / packed conv bias / fc1 bias / fc2 bias / attention bias.
    bconv = jnp.concatenate([jnp.repeat(br[2][:, 0], HP) for br in branches])   # (192,)
    b1_all = jnp.concatenate([br[4].reshape(-1) for br in branches])            # (96,)
    b2_all = jnp.concatenate([br[6].reshape(-1) for br in branches])            # (24,)
    aux = jnp.zeros((8, L * E), jnp.float32)
    aux = aux.at[0, :].set(watt.reshape(-1))
    aux = aux.at[1, :NCONV].set(bconv)
    aux = aux.at[2, :NHID].set(b1_all)
    aux = aux.at[3, :NOUT].set(b2_all)
    aux = aux.at[4, 0].set(batt[0, 0])
    return wconv, wfc, aux


# --------------------------------- wrapper ------------------------------------
def global_attention(x, packed):
    wconv, wfc, aux = packed
    x_flat = x.reshape(B, L * E)

    def full_spec(shape):
        nd = len(shape)
        return pl.BlockSpec(shape, lambda i, _nd=nd: (0,) * _nd)

    inputs = (x_flat, wconv, wfc, aux)
    out = pl.pallas_call(
        global_attention_kernel,
        grid=(1,),
        in_specs=[full_spec(a.shape) for a in inputs],
        out_specs=full_spec((B, NOUT)),
        out_shape=jax.ShapeDtypeStruct((B, NOUT), jnp.float32),
        compiler_params=pltpu.CompilerParams(dimension_semantics=("arbitrary",)),
    )(*inputs)
    return out[:, 0:OUT], out[:, OUT:2 * OUT], out[:, 2 * OUT:3 * OUT]


# ---------------------- plain-JAX reference (for checking) --------------------
def reference(x, params):
    (watt, batt,
     wc2, bc2, w12, b12, w22, b22,
     wc3, bc3, w13, b13, w23, b23,
     wc4, bc4, w14, b14, w24, b24) = params
    s = jnp.einsum('ble,le->b', x, watt) + batt[0, 0]
    score = 1.0 / (1.0 + jnp.exp(-s))
    xatt = x * score[:, None, None]

    def branch(k, wc, bc, w1, b1, w2, b2):
        H = L - k + 1
        patches = jnp.stack([xatt[:, j:j + H, :] for j in range(k)], axis=2)  # (B,H,k,E)
        conv = jnp.tanh(jnp.einsum('bhje,jce->bch', patches, wc) + bc[None, :, :])
        flat = conv.reshape(B, C * H)                      # c-major, like torch .view
        h = jnp.maximum(flat @ w1.reshape(C * H, HID) + b1, 0.0)
        return h @ w2 + b2

    return (branch(2, wc2, bc2, w12, b12, w22, b22),
            branch(3, wc3, bc3, w13, b13, w23, b23),
            branch(4, wc4, bc4, w14, b14, w24, b24))


# ----------------------------------- main --------------------------------------
if __name__ == "__main__":
    key = jax.random.PRNGKey(0)
    keys = iter(jax.random.split(key, 32))

    def nrm(shape, scale=0.1):
        return (scale * jax.random.normal(next(keys), shape)).astype(jnp.float32)

    x = nrm((B, L, E), scale=1.0)

    params = [nrm((L, E)), nrm((1, 1))]          # attention conv weight / bias
    for k in KS:
        H = L - k + 1
        params += [
            nrm((k, C, E)),        # conv-k weight   [j, c, e]
            nrm((C, 1)),           # conv-k bias
            nrm((C, H, HID)),      # fc1 weight (c-major flatten layout)
            nrm((1, HID)),         # fc1 bias
            nrm((HID, OUT)),       # fc2 weight (already transposed)
            nrm((1, OUT)),         # fc2 bias
        ]
    params = tuple(params)

    packed = pack_params(params)                 # one-time host-side packing
    out1, out2, out3 = jax.block_until_ready(global_attention(x, packed))
    r1, r2, r3 = reference(x, params)

    assert out1.shape == (B, OUT) and out2.shape == (B, OUT) and out3.shape == (B, OUT)
    for got, want in ((out1, r1), (out2, r2), (out3, r3)):
        assert jnp.allclose(got, want, atol=2e-4, rtol=2e-4), (got, want)

    # TODO(synk): nn.Dropout is treated as identity (inference mode only).
    print("KERNEL_OK")
</pallas_src>

<mosaic_0001>
module attributes {stable_mosaic.version = 11 : i64} {
  func.func @global_attention_kernel(%arg0: i32, %arg1: memref<2x512xf32, #tpu.memory_space<vmem>>, %arg2: memref<512x192xf32, #tpu.memory_space<vmem>>, %arg3: memref<288x96xf32, #tpu.memory_space<vmem>>, %arg4: memref<8x512xf32, #tpu.memory_space<vmem>>, %arg5: memref<2x24xf32, #tpu.memory_space<vmem>>) attributes {dimension_semantics = [#tpu.dimension_semantics<arbitrary>], iteration_bounds = array<i64: 1>, scalar_prefetch = 0 : i64, scratch_operands = 0 : i64, tpu.core_type = #tpu.core_type<tc>, window_params = [{pipeline_mode = #tpu.pipeline_mode<synchronous>, transform_indices = @transform_0, window_bounds = array<i64: 2, 512>}, {pipeline_mode = #tpu.pipeline_mode<synchronous>, transform_indices = @transform_1, window_bounds = array<i64: 512, 192>}, {pipeline_mode = #tpu.pipeline_mode<synchronous>, transform_indices = @transform_2, window_bounds = array<i64: 288, 96>}, {pipeline_mode = #tpu.pipeline_mode<synchronous>, transform_indices = @transform_3, window_bounds = array<i64: 8, 512>}, {pipeline_mode = #tpu.pipeline_mode<synchronous>, transform_indices = @transform_4, window_bounds = array<i64: 2, 24>}]} {
    %c0 = arith.constant 0 : index
    %c0_0 = arith.constant 0 : index
    %0 = vector.load %arg1[%c0, %c0_0] : memref<2x512xf32, #tpu.memory_space<vmem>>, vector<2x512xf32>
    %c0_1 = arith.constant 0 : index
    %c0_2 = arith.constant 0 : index
    %1 = vector.load %arg4[%c0_1, %c0_2] : memref<8x512xf32, #tpu.memory_space<vmem>>, vector<1x512xf32>
    %c4 = arith.constant 4 : index
    %c0_3 = arith.constant 0 : index
    %2 = vector.load %arg4[%c4, %c0_3] : memref<8x512xf32, #tpu.memory_space<vmem>>, vector<1x1xf32>
    %3 = vector.broadcast %1 : vector<1x512xf32> to vector<2x512xf32>
    %4 = arith.mulf %0, %3 : vector<2x512xf32>
    %cst = arith.constant dense<0.000000e+00> : vector<2xf32>
    %5 = vector.multi_reduction <add>, %4, %cst [1] : vector<2x512xf32> to vector<2xf32>
    %6 = vector.shape_cast %5 : vector<2xf32> to vector<2x1xf32>
    %7 = vector.broadcast %2 : vector<1x1xf32> to vector<2x1xf32>
    %8 = arith.addf %6, %7 : vector<2x1xf32>
    %cst_4 = arith.constant 0.000000e+00 : f32
    %9 = vector.broadcast %cst_4 : f32 to vector<2x1xf32>
    %10 = arith.subf %9, %8 : vector<2x1xf32>
    %11 = math.exp %10 : vector<2x1xf32>
    %cst_5 = arith.constant 1.000000e+00 : f32
    %12 = vector.broadcast %cst_5 : f32 to vector<2x1xf32>
    %13 = arith.addf %12, %11 : vector<2x1xf32>
    %cst_6 = arith.constant 1.000000e+00 : f32
    %14 = vector.broadcast %cst_6 : f32 to vector<2x1xf32>
    %15 = arith.divf %14, %13 : vector<2x1xf32>
    %c0_7 = arith.constant 0 : index
    %c0_8 = arith.constant 0 : index
    %16 = vector.load %arg2[%c0_7, %c0_8] : memref<512x192xf32, #tpu.memory_space<vmem>>, vector<512x192xf32>
    %cst_9 = arith.constant dense<0.000000e+00> : vector<2x192xf32>
    %17 = tpu.matmul %0, %16, %cst_9 {dimension_numbers = #tpu.dot_dimension_numbers<[1], [0], [0], [1], [0, 0, 1, 1], [], []>} : vector<2x512xf32>, vector<512x192xf32>, vector<2x192xf32> -> vector<2x192xf32>
    %c1 = arith.constant 1 : index
    %c0_10 = arith.constant 0 : index
    %18 = vector.load %arg4[%c1, %c0_10] : memref<8x512xf32, #tpu.memory_space<vmem>>, vector<1x192xf32>
    %19 = vector.broadcast %15 : vector<2x1xf32> to vector<2x192xf32>
    %20 = arith.mulf %19, %17 : vector<2x192xf32>
    %21 = vector.broadcast %18 : vector<1x192xf32> to vector<2x192xf32>
    %22 = arith.addf %20, %21 : vector<2x192xf32>
    %23 = math.tanh %22 : vector<2x192xf32>
    %c0_11 = arith.constant 0 : index
    %c0_12 = arith.constant 0 : index
    %24 = vector.load %arg3[%c0_11, %c0_12] : memref<288x96xf32, #tpu.memory_space<vmem>>, vector<192x96xf32>
    %c2 = arith.constant 2 : index
    %c0_13 = arith.constant 0 : index
    %25 = vector.load %arg4[%c2, %c0_13] : memref<8x512xf32, #tpu.memory_space<vmem>>, vector<1x96xf32>
    %cst_14 = arith.constant dense<0.000000e+00> : vector<2x96xf32>
    %26 = tpu.matmul %23, %24, %cst_14 {dimension_numbers = #tpu.dot_dimension_numbers<[1], [0], [0], [1], [0, 0, 1, 1], [], []>} : vector<2x192xf32>, vector<192x96xf32>, vector<2x96xf32> -> vector<2x96xf32>
    %27 = vector.broadcast %25 : vector<1x96xf32> to vector<2x96xf32>
    %28 = arith.addf %26, %27 : vector<2x96xf32>
    %cst_15 = arith.constant 0.000000e+00 : f32
    %29 = vector.broadcast %cst_15 : f32 to vector<2x96xf32>
    %30 = arith.maximumf %28, %29 : vector<2x96xf32>
    %c192 = arith.constant 192 : index
    %c0_16 = arith.constant 0 : index
    %31 = vector.load %arg3[%c192, %c0_16] : memref<288x96xf32, #tpu.memory_space<vmem>>, vector<96x24xf32>
    %c3 = arith.constant 3 : index
    %c0_17 = arith.constant 0 : index
    %32 = vector.load %arg4[%c3, %c0_17] : memref<8x512xf32, #tpu.memory_space<vmem>>, vector<1x24xf32>
    %cst_18 = arith.constant dense<0.000000e+00> : vector<2x24xf32>
    %33 = tpu.matmul %30, %31, %cst_18 {dimension_numbers = #tpu.dot_dimension_numbers<[1], [0], [0], [1], [0, 0, 1, 1], [], []>} : vector<2x96xf32>, vector<96x24xf32>, vector<2x24xf32> -> vector<2x24xf32>
    %34 = vector.broadcast %32 : vector<1x24xf32> to vector<2x24xf32>
    %35 = arith.addf %33, %34 : vector<2x24xf32>
    %c0_19 = arith.constant 0 : index
    %c0_20 = arith.constant 0 : index
    %36 = vector.load %arg5[%c0_19, %c0_20] : memref<2x24xf32, #tpu.memory_space<vmem>>, vector<2x24xf32>
    tpu.vector_store %arg5[%c0_19, %c0_20], %35 {strides = array<i32>} : memref<2x24xf32, #tpu.memory_space<vmem>>, vector<2x24xf32>,
    return
  }
  func.func @transform_0(%arg0: i32) -> (i32, i32) {
    %c0_i32 = arith.constant 0 : i32
    %c0_i32_0 = arith.constant 0 : i32
    %c0_i32_1 = arith.constant 0 : i32
    return %c0_i32, %c0_i32_0 : i32, i32
  }
  func.func @transform_1(%arg0: i32) -> (i32, i32) {
    %c0_i32 = arith.constant 0 : i32
    %c0_i32_0 = arith.constant 0 : i32
    %c0_i32_1 = arith.constant 0 : i32
    return %c0_i32, %c0_i32_0 : i32, i32
  }
  func.func @transform_2(%arg0: i32) -> (i32, i32) {
    %c0_i32 = arith.constant 0 : i32
    %c0_i32_0 = arith.constant 0 : i32
    %c0_i32_1 = arith.constant 0 : i32
    return %c0_i32, %c0_i32_0 : i32, i32
  }
  func.func @transform_3(%arg0: i32) -> (i32, i32) {
    %c0_i32 = arith.constant 0 : i32
    %c0_i32_0 = arith.constant 0 : i32
    %c0_i32_1 = arith.constant 0 : i32
    return %c0_i32, %c0_i32_0 : i32, i32
  }
  func.func @transform_4(%arg0: i32) -> (i32, i32) {
    %c0_i32 = arith.constant 0 : i32
    %c0_i32_0 = arith.constant 0 : i32
    %c0_i32_1 = arith.constant 0 : i32
    return %c0_i32, %c0_i32_0 : i32, i32
  }
}

</mosaic_0001>

<bundles_post_ra>
// kernel: tpu_custom_call.1
= control target key start
LH: loop header
LB: loop body
LE: loop exit
PB: predicated region body
PF: predicated region fallthrough
CT: control target
= control target key end

     0   :  { %v22_v13 = vlaneseq  ;;  %v882_v20 = vmov 1983009808   ;;  %vm79_vm0 = vcmask 1041408   ;;  %s1496_s0 = inlined_call_operand.vmem [shape: f32[2,512], index: 0, kind: input, shape index: {}]   ;;  %s1497_s1 = inlined_call_operand.vmem [shape: f32[512,192], index: 1, kind: input, shape index: {}]   ;;  %s1498_s2 = inlined_call_operand.vmem [shape: f32[288,96], index: 2, kind: input, shape index: {}]   ;;  %s1499_s3 = inlined_call_operand.vmem [shape: f32[8,512], index: 3, kind: input, shape index: {}]   ;;  %s1500_s4 = inlined_call_operand.hbm [shape: f32[2,24], index: 4, kind: output, shape index: {}]  }
   0x1   :  { %v97_v0 = vld [vmem:[%s1497_s1 + $0x8] sm:$0xff]  ;;  %v99_v1 = vld [vmem:[%s1497_s1 + $0x18] sm:$0xff]  ;;  %v96_v2 = vld [vmem:[%s1497_s1] sm:$0xff]  ;;  %v41_v21 = vunpack.c.l.s4 %v882_v20 }
   0x2   :  { %v658_v3 = vpack.c.bf16 %v99_v1, %v97_v0  ;;  %v98_v4 = vld [vmem:[%s1497_s1 + $0x10] sm:$0xff]  ;;  %v101_v5 = vld [vmem:[%s1497_s1 + $0x28] sm:$0xff]  ;;  %v103_v6 = vld [vmem:[%s1497_s1 + $0x38] sm:$0xff]  ;;  %v955_v22 = vshrl.u32 %v22_v13, 7 }
   0x3   :  { %v660_v7 = vpack.c.bf16 %v98_v4, %v96_v2  ;;  %v662_v8 = vpack.c.bf16 %v103_v6, %v101_v5  ;;  %v100_v9 = vld [vmem:[%s1497_s1 + $0x20] sm:$0xff]  ;;  %v102_v10 = vld [vmem:[%s1497_s1 + $0x30] sm:$0xff]  ;;  %v105_v11 = vld [vmem:[%s1497_s1 + $0x48] sm:$0xff]  ;;  %v42_v29 = vunpack.c.0.s8 %v41_v21 }
   0x4   :  { %659 = vmatprep.subr.bf16.mxu0 %v658_v3  ;;  %v107_v12 = vld [vmem:[%s1497_s1 + $0x58] sm:$0xff]  ;;  %v664_v14 = vpack.c.bf16 %v102_v10, %v100_v9  ;;  %v104_v16 = vld [vmem:[%s1497_s1 + $0x40] sm:$0xff]  ;;  %v106_v17 = vld [vmem:[%s1497_s1 + $0x50] sm:$0xff]  ;;  %v24_v30 = vsub.s32 0, %v955_v22  ;;  %v28_v31 = vsub.s32 1, %v955_v22  ;;  %v32_v32 = vsub.s32 2, %v955_v22 }
   0x5   :  { %661 = vmatpush1.bf16.msra.mxu0 %v660_v7  ;;  %v666_v15 = vpack.c.bf16 %v107_v12, %v105_v11  ;;  %v109_v18 = vld [vmem:[%s1497_s1 + $0x68] sm:$0xff]  ;;  %v111_v19 = vld [vmem:[%s1497_s1 + $0x78] sm:$0xff]  ;;  %v668_v23 = vpack.c.bf16 %v106_v17, %v104_v16  ;;  %v108_v25 = vld [vmem:[%s1497_s1 + $0x60] sm:$0xff]  ;;  %v36_v33 = vsub.s32 3, %v955_v22  ;;  %v989_v41 = vsub.s32 %v42_v29, %v955_v22 }
   0x6   :  { %663 = vmatprep.subr.bf16.mxu0 %v662_v8  ;;  %v670_v24 = vpack.c.bf16 %v111_v19, %v109_v18  ;;  %v110_v26 = vld [vmem:[%s1497_s1 + $0x70] sm:$0xff]  ;;  %v113_v27 = vld [vmem:[%s1497_s1 + $0x88] sm:$0xff]  ;;  %v115_v28 = vld [vmem:[%s1497_s1 + $0x98] sm:$0xff] }
   0x7   :  { %v672_v34 = vpack.c.bf16 %v110_v26, %v108_v25  ;;  %v674_v35 = vpack.c.bf16 %v115_v28, %v113_v27  ;;  %v112_v36 = vld [vmem:[%s1497_s1 + $0x80] sm:$0xff]  ;;  %v114_v37 = vld [vmem:[%s1497_s1 + $0x90] sm:$0xff]  ;;  %v117_v38 = vld [vmem:[%s1497_s1 + $0xa8] sm:$0xff] }
   0x8   :  { %v119_v39 = vld [vmem:[%s1497_s1 + $0xb8] sm:$0xff]  ;;  %v994_v42 = vld [vmem:[%s1496_s0] sm:$0xff]  ;;  %v676_v47 = vpack.c.bf16 %v114_v37, %v112_v36  ;;  %v118_v51 = vld [vmem:[%s1497_s1 + $0xb0] sm:$0xff] }
   0x9   :  { %665 = vmatpush1.bf16.msra.mxu0 %v664_v14  ;;  %v19_v40 = vld [vmem:[%s1499_s3] ss:$8 sm:$0xf]  ;;  %v1002_v48 = vrot.slane %v994_v42, %v989_v41  ;;  %v678_v49 = vpack.c.bf16 %v119_v39, %v117_v38 }
   0xa   :  { %667 = vmatprep.subr.bf16.mxu0 %v666_v15  ;;  %v25_v43 = vrot.slane %v19_v40, %v24_v30  ;;  %v29_v44 = vrot.slane %v19_v40, %v28_v31  ;;  %v33_v45 = vrot.slane %v19_v40, %v32_v32  ;;  %v37_v46 = vrot.slane %v19_v40, %v36_v33  ;;  %v116_v50 = vld [vmem:[%s1497_s1 + $0xa0] sm:$0xff]  ;;  %v121_v54 = vld [vmem:[%s1497_s1 + $0xc8] sm:$0xff]  ;;  %v123_v55 = vld [vmem:[%s1497_s1 + $0xd8] sm:$0xff] }
   0xb   :  { %v240_v56 = vcombine.high %v1002_v48, %v1002_v48  ;;  %v680_v59 = vpack.c.bf16 %v118_v51, %v116_v50  ;;  %v682_v60 = vpack.c.bf16 %v123_v55, %v121_v54  ;;  %v120_v61 = vld [vmem:[%s1497_s1 + $0xc0] sm:$0xff]  ;;  %v122_v62 = vld [vmem:[%s1497_s1 + $0xd0] sm:$0xff]  ;;  %v125_v0 = vld [vmem:[%s1497_s1 + $0xe8] sm:$0xff] }
   0xc   :  { %v38_v52 = vcombine.low %v25_v43, %v29_v44  ;;  %v39_v53 = vcombine.low %v33_v45, %v37_v46  ;;  %v127_v1 = vld [vmem:[%s1497_s1 + $0xf8] sm:$0xff]  ;;  %v684_v3 = vpack.c.bf16 %v122_v62, %v120_v61  ;;  %v124_v5 = vld [vmem:[%s1497_s1 + $0xe0] sm:$0xff]  ;;  %v126_v6 = vld [vmem:[%s1497_s1 + $0xf0] sm:$0xff] }
   0xd   :  { %669 = vmatpush1.bf16.msra.mxu0 %v668_v23  ;;  %310 = vmatprep.mubr.f32.mxu0 %v240_v56  ;;  %v686_v4 = vpack.c.bf16 %v127_v1, %v125_v0  ;;  %v129_v9 = vld [vmem:[%s1497_s1 + $0x108] sm:$0xff]  ;;  %v131_v10 = vld [vmem:[%s1497_s1 + $0x118] sm:$0xff]  ;;  %v688_v14 = vpack.c.bf16 %v126_v6, %v124_v5  ;;  %v128_v16 = vld [vmem:[%s1497_s1 + $0x100] sm:$0xff] }
   0xe   :  { %671 = vmatprep.subr.bf16.mxu0 %v670_v24  ;;  %v46_v57 = vrot.slane %v38_v52, %v989_v41  ;;  %v53_v58 = vrot.slane %v39_v53, %v989_v41  ;;  %v690_v15 = vpack.c.bf16 %v131_v10, %v129_v9  ;;  %v130_v17 = vld [vmem:[%s1497_s1 + $0x110] sm:$0xff]  ;;  %v133_v21 = vld [vmem:[%s1497_s1 + $0x128] sm:$0xff]  ;;  %v135_v23 = vld [vmem:[%s1497_s1 + $0x138] sm:$0xff] }
   0xf   :  { %v692_v26 = vpack.c.bf16 %v130_v17, %v128_v16  ;;  %v694_v28 = vpack.c.bf16 %v135_v23, %v133_v21  ;;  %v132_v29 = vld [vmem:[%s1497_s1 + $0x120] sm:$0xff]  ;;  %v134_v32 = vld [vmem:[%s1497_s1 + $0x130] sm:$0xff]  ;;  %v137_v33 = vld [vmem:[%s1497_s1 + $0x148] sm:$0xff] }
  0x10   :  { %v54_v63 = vcombine.low %v46_v57, %v53_v58  ;;  %v696_v36 = vpack.c.bf16 %v134_v32, %v132_v29  ;;  %v136_v38 = vld [vmem:[%s1497_s1 + $0x140] sm:$0xff]  ;;  %v138_v39 = vld [vmem:[%s1497_s1 + $0x150] sm:$0xff]  ;;  %v141_v40 = vld [vmem:[%s1497_s1 + $0x168] sm:$0xff] }
  0x11   :  { %673 = vmatpush1.bf16.msra.mxu0 %v672_v34  ;;  %v139_v34 = vld [vmem:[%s1497_s1 + $0x158] sm:$0xff]  ;;  %v700_v44 = vpack.c.bf16 %v138_v39, %v136_v38  ;;  %v140_v46 = vld [vmem:[%s1497_s1 + $0x160] sm:$0xff] }
  0x12   :  { %675 = vmatprep.subr.bf16.mxu0 %v674_v35  ;;  %v56_v2 = vmul.f32 %v54_v63, %v994_v42  ;;  %v698_v37 = vpack.c.bf16 %v139_v34, %v137_v33  ;;  %v143_v43 = vld [vmem:[%s1497_s1 + $0x178] sm:$0xff] }
  0x13   :  { %v702_v45 = vpack.c.bf16 %v143_v43, %v141_v40  ;;  %v147_v50 = vld [vmem:[%s1497_s1 + $0x198] sm:$0xff] }
  0x14   :  { %v58_v7 = vcombine.high %v56_v2, %v56_v2  ;;  %v65_v8 = vrot.slane %v56_v2, %v989_v41 }
  0x15   :  { %677 = vmatpush1.bf16.msra.mxu0 %v676_v47  ;;  %v142_v47 = vld [vmem:[%s1497_s1 + $0x170] sm:$0xff] }
  0x16   :  { %679 = vmatprep.subr.bf16.mxu0 %v678_v49  ;;  %v72_v11 = vrot.slane %v58_v7, %v989_v41  ;;  %v73_v12 = vcombine.high %v65_v8, %v65_v8  ;;  %v80_v13 = vsel %vm79_vm0, %v65_v8, 0.0  ;;  %v145_v49 = vld [vmem:[%s1497_s1 + $0x188] sm:$0xff] }
  0x18   :  { %v74_v18 = vcombine.high %v72_v11, %v72_v11  ;;  %v81_v19 = vsel %vm79_vm0, %v73_v12, 0.0  ;;  %v83_v20 = vsel %vm79_vm0, %v72_v11, 0.0 }
  0x19   :  { %681 = vmatpush1.bf16.msra.mxu0 %v680_v59  ;;  %v82_v24 = vadd.f32 %v81_v19, %v80_v13 }
  0x1a   :  { %683 = vmatprep.subr.bf16.mxu0 %v682_v60  ;;  %v85_v25 = vsel %vm79_vm0, %v74_v18, 0.0 }
  0x1b   :  { %v84_v27 = vadd.f32 %v83_v20, %v82_v24 }
  0x1d   :  { %685 = vmatpush1.bf16.msra.mxu0 %v684_v3  ;;  %v86_v35 = vadd.f32 %v85_v25, %v84_v27 }
  0x1e   :  { %687 = vmatprep.subr.bf16.mxu0 %v686_v4 }
  0x1f   :  { %87 = vadd.xlane.f32.xlu0 %v86_v35 }
  0x21   :  { %689 = vmatpush1.bf16.msra.mxu0 %v688_v14 }
  0x22   :  { %691 = vmatprep.subr.bf16.mxu0 %v690_v15 }
  0x25   :  { %693 = vmatpush1.bf16.msra.mxu0 %v692_v26 }
  0x26   :  { %695 = vmatprep.subr.bf16.mxu0 %v694_v28 }
  0x29   :  { %697 = vmatpush1.bf16.msra.mxu0 %v696_v36 }
  0x2a   :  { %699 = vmatprep.subr.bf16.mxu0 %v698_v37 }
  0x2b   :  { %9 = vsyncpa [#allocation3], 0  ;;  %v704_v51 = vpack.c.bf16 %v142_v47, %v140_v46  ;;  %v706_v52 = vpack.c.bf16 %v147_v50, %v145_v49  ;;  %v144_v53 = vld [vmem:[%s1497_s1 + $0x180] sm:$0xff]  ;;  %v146_v54 = vld [vmem:[%s1497_s1 + $0x190] sm:$0xff]  ;;  %v225_v6 = vcombine.high %v994_v42, %v994_v42  ;;  %v883_v32 = vmov 0  }
  0x2c   :  { %v149_v55 = vld [vmem:[%s1497_s1 + $0x1a8] sm:$0xff]  ;;  %v151_v56 = vld [vmem:[%s1497_s1 + $0x1b8] sm:$0xff]  ;;  %v708_v57 = vpack.c.bf16 %v146_v54, %v144_v53  ;;  %v148_v59 = vld [vmem:[%s1497_s1 + $0x1a0] sm:$0xff]  ;;  %848 = vset.pattern.permute.xlu0 %v883_v32  ;;  %vm437_vm1 = vcmask 523264   ;;  %vm885_vm2 = vmmov 0   ;;  %vm525_vm3 = vcmask 785408  }
  0x2d   :  { %701 = vmatpush1.bf16.msra.mxu0 %v700_v44  ;;  %v710_v58 = vpack.c.bf16 %v151_v56, %v149_v55  ;;  %v150_v60 = vld [vmem:[%s1497_s1 + $0x1b0] sm:$0xff]  ;;  %v153_v61 = vld [vmem:[%s1497_s1 + $0x1c8] sm:$0xff]  ;;  %v155_v62 = vld [vmem:[%s1497_s1 + $0x1d8] sm:$0xff]  ;;  %v1150_v12 = vrot.slane %v225_v6, %v989_v41  ;;  %v884_v55 = vmov 0.0|0.0   ;;  %vm599_vm4 = vcmask 189440  }
  0x2e   :  { %703 = vmatprep.subr.bf16.mxu0 %v702_v45  ;;  %v712_v63 = vpack.c.bf16 %v150_v60, %v148_v59  ;;  %v714_v0 = vpack.c.bf16 %v155_v62, %v153_v61  ;;  %v152_v1 = vld [vmem:[%s1497_s1 + $0x1c0] sm:$0xff]  ;;  %v154_v2 = vld [vmem:[%s1497_s1 + $0x1d0] sm:$0xff]  ;;  %v157_v3 = vld [vmem:[%s1497_s1 + $0x1e8] sm:$0xff]  ;;  %786 = vmatprep.subr.bf16.mxu1 %v884_v55 }
  0x2f   :  { %v159_v4 = vld [vmem:[%s1497_s1 + $0x1f8] sm:$0xff]  ;;  %v716_v5 = vpack.c.bf16 %v154_v2, %v152_v1  ;;  %v156_v8 = vld [vmem:[%s1497_s1 + $0x1e0] sm:$0xff]  ;;  %v158_v9 = vld [vmem:[%s1497_s1 + $0x1f0] sm:$0xff]  ;;  %v241_v18 = vcombine.high %v1150_v12, %v1150_v12 }
  0x30   :  { %v718_v7 = vpack.c.bf16 %v159_v4, %v157_v3  ;;  %v161_v10 = vld [vmem:[%s1497_s1 + $0x208] sm:$0xff]  ;;  %v163_v11 = vld [vmem:[%s1497_s1 + $0x218] sm:$0xff]  ;;  %v720_v42 = vpack.c.bf16 %v158_v9, %v156_v8  ;;  %v160_v14 = vld [vmem:[%s1497_s1 + $0x200] sm:$0xff] }
  0x31   :  { %705 = vmatpush1.bf16.msra.mxu0 %v704_v51  ;;  %v722_v13 = vpack.c.bf16 %v163_v11, %v161_v10  ;;  %v162_v15 = vld [vmem:[%s1497_s1 + $0x210] sm:$0xff]  ;;  %v165_v16 = vld [vmem:[%s1497_s1 + $0x228] sm:$0xff]  ;;  %v167_v17 = vld [vmem:[%s1497_s1 + $0x238] sm:$0xff] }
  0x32   :  { %707 = vmatprep.subr.bf16.mxu0 %v706_v52  ;;  %v724_v41 = vpack.c.bf16 %v162_v15, %v160_v14  ;;  %v726_v19 = vpack.c.bf16 %v167_v17, %v165_v16  ;;  %v164_v20 = vld [vmem:[%s1497_s1 + $0x220] sm:$0xff]  ;;  %v166_v21 = vld [vmem:[%s1497_s1 + $0x230] sm:$0xff]  ;;  %v169_v23 = vld [vmem:[%s1497_s1 + $0x248] sm:$0xff] }
  0x33   :  { %v171_v24 = vld [vmem:[%s1497_s1 + $0x258] sm:$0xff]  ;;  %v728_v25 = vpack.c.bf16 %v166_v21, %v164_v20  ;;  %v168_v27 = vld [vmem:[%s1497_s1 + $0x240] sm:$0xff]  ;;  %v170_v28 = vld [vmem:[%s1497_s1 + $0x250] sm:$0xff] }
  0x34   :  { %v730_v26 = vpack.c.bf16 %v171_v24, %v169_v23  ;;  %v173_v29 = vld [vmem:[%s1497_s1 + $0x268] sm:$0xff]  ;;  %v732_v33 = vpack.c.bf16 %v170_v28, %v168_v27  ;;  %v172_v35 = vld [vmem:[%s1497_s1 + $0x260] sm:$0xff]  ;;  %v174_v36 = vld [vmem:[%s1497_s1 + $0x270] sm:$0xff] }
  0x35   :  { %709 = vmatpush1.bf16.msra.mxu0 %v708_v57  ;;  %v177_v37 = vld [vmem:[%s1497_s1 + $0x288] sm:$0xff]  ;;  %v179_v38 = vld [vmem:[%s1497_s1 + $0x298] sm:$0xff]  ;;  %v736_v39 = vpack.c.bf16 %v174_v36, %v172_v35  ;;  %v176_v43 = vld [vmem:[%s1497_s1 + $0x280] sm:$0xff] }
  0x36   :  { %711 = vmatprep.subr.bf16.mxu0 %v710_v58  ;;  %v738_v40 = vpack.c.bf16 %v179_v38, %v177_v37  ;;  %v178_v44 = vld [vmem:[%s1497_s1 + $0x290] sm:$0xff]  ;;  %v181_v45 = vld [vmem:[%s1497_s1 + $0x2a8] sm:$0xff]  ;;  %v183_v46 = vld [vmem:[%s1497_s1 + $0x2b8] sm:$0xff] }
  0x37   :  { %v740_v47 = vpack.c.bf16 %v178_v44, %v176_v43  ;;  %v412_v49 = vld [vmem:[%s1498_s2] sm:$0xff]  ;;  %v413_v50 = vld [vmem:[%s1498_s2 + $0x8] sm:$0xff]  ;;  %v414_v51 = vld [vmem:[%s1498_s2 + $0x10] sm:$0xff]  ;;  %v742_v52 = vpack.c.bf16 %v183_v46, %v181_v45 }
  0x38   :  { %v180_v53 = vld [vmem:[%s1497_s1 + $0x2a0] sm:$0xff]  ;;  %v182_v54 = vld [vmem:[%s1497_s1 + $0x2b0] sm:$0xff]  ;;  %v787_v56 = vpack.c.bf16 %v413_v50, %v412_v49  ;;  %v415_v57 = vld [vmem:[%s1498_s2 + $0x18] sm:$0xff] }
  0x39   :  { %713 = vmatpush1.bf16.msra.mxu0 %v712_v63  ;;  %v185_v58 = vld [vmem:[%s1497_s1 + $0x2c8] sm:$0xff]  ;;  %v187_v59 = vld [vmem:[%s1497_s1 + $0x2d8] sm:$0xff]  ;;  %v790_v60 = vpack.c.bf16 %v415_v57, %v414_v51  ;;  %v744_v61 = vpack.c.bf16 %v182_v54, %v180_v53  ;;  %v416_v62 = vld [vmem:[%s1498_s2 + $0x20] sm:$0xff] }
  0x3a   :  { %715 = vmatprep.subr.bf16.mxu0 %v714_v0  ;;  %788 = vmatpush1.bf16.msra.mxu1 %v787_v56  ;;  %v417_v63 = vld [vmem:[%s1498_s2 + $0x28] sm:$0xff]  ;;  %v746_v0 = vpack.c.bf16 %v187_v59, %v185_v58  ;;  %v184_v1 = vld [vmem:[%s1497_s1 + $0x2c0] sm:$0xff]  ;;  %v186_v2 = vld [vmem:[%s1497_s1 + $0x2d0] sm:$0xff] }
  0x3b   :  { %789 = vmatprep.subr.bf16.mxu1 %v884_v55  ;;  %v189_v3 = vld [vmem:[%s1497_s1 + $0x2e8] sm:$0xff]  ;;  %v191_v4 = vld [vmem:[%s1497_s1 + $0x2f8] sm:$0xff]  ;;  %v748_v6 = vpack.c.bf16 %v186_v2, %v184_v1  ;;  %v188_v10 = vld [vmem:[%s1497_s1 + $0x2e0] sm:$0xff] }
  0x3c   :  { %v419_v8 = vld [vmem:[%s1498_s2 + $0x38] sm:$0xff]  ;;  %v750_v9 = vpack.c.bf16 %v191_v4, %v189_v3  ;;  %v190_v11 = vld [vmem:[%s1497_s1 + $0x2f0] sm:$0xff]  ;;  %v420_v16 = vld [vmem:[%s1498_s2 + $0x40] sm:$0xff] }
  0x3d   :  { %717 = vmatpush1.bf16.msra.mxu0 %v716_v5  ;;  %v793_v5 = vpack.c.bf16 %v417_v63, %v416_v62  ;;  %v752_v15 = vpack.c.bf16 %v190_v11, %v188_v10  ;;  %v421_v17 = vld [vmem:[%s1498_s2 + $0x48] sm:$0xff]  ;;  %v199_v21 = vld [vmem:[%s1497_s1 + $0x338] sm:$0xff]  ;;  %v196_v28 = vld [vmem:[%s1497_s1 + $0x320] sm:$0xff] }
  0x3e   :  { %719 = vmatprep.subr.bf16.mxu0 %v718_v7  ;;  %791 = vmatpush1.bf16.msra.mxu1 %v790_v60  ;;  %v418_v7 = vld [vmem:[%s1498_s2 + $0x30] sm:$0xff]  ;;  %v197_v20 = vld [vmem:[%s1497_s1 + $0x328] sm:$0xff]  ;;  %v799_v23 = vpack.c.bf16 %v421_v17, %v420_v16  ;;  %v203_v32 = vld [vmem:[%s1497_s1 + $0x358] sm:$0xff] }
  0x3f   :  { %792 = vmatprep.subr.bf16.mxu1 %v884_v55  ;;  %v796_v14 = vpack.c.bf16 %v419_v8, %v418_v7  ;;  %v758_v27 = vpack.c.bf16 %v199_v21, %v197_v20  ;;  %v424_v35 = vld [vmem:[%s1498_s2 + $0x60] sm:$0xff]  ;;  %v425_v36 = vld [vmem:[%s1498_s2 + $0x68] sm:$0xff]  ;;  %v207_v43 = vld [vmem:[%s1497_s1 + $0x378] sm:$0xff] }
  0x40   :  { %v200_v38 = vld [vmem:[%s1497_s1 + $0x340] sm:$0xff]  ;;  %v805_v44 = vpack.c.bf16 %v425_v36, %v424_v35  ;;  %v426_v46 = vld [vmem:[%s1498_s2 + $0x70] sm:$0xff]  ;;  %v211_v53 = vld [vmem:[%s1497_s1 + $0x398] sm:$0xff] }
  0x41   :  { %721 = vmatpush1.bf16.msra.mxu0 %v720_v42  ;;  %v193_v42 = vld [vmem:[%s1497_s1 + $0x308] sm:$0xff]  ;;  %v204_v50 = vld [vmem:[%s1497_s1 + $0x360] sm:$0xff]  ;;  %v206_v51 = vld [vmem:[%s1497_s1 + $0x370] sm:$0xff] }
  0x42   :  { %723 = vmatprep.subr.bf16.mxu0 %v722_v13  ;;  %v195_v13 = vld [vmem:[%s1497_s1 + $0x318] sm:$0xff]  ;;  %794 = vmatpush1.bf16.msra.mxu1 %v793_v5  ;;  %v768_v56 = vpack.c.bf16 %v206_v51, %v204_v50  ;;  %v208_v58 = vld [vmem:[%s1497_s1 + $0x380] sm:$0xff]  ;;  %v210_v59 = vld [vmem:[%s1497_s1 + $0x390] sm:$0xff] }
  0x43   :  { %795 = vmatprep.subr.bf16.mxu1 %v884_v55  ;;  %v213_v60 = vld [vmem:[%s1497_s1 + $0x3a8] sm:$0xff]  ;;  %v772_v62 = vpack.c.bf16 %v210_v59, %v208_v58  ;;  %v214_v1 = vld [vmem:[%s1497_s1 + $0x3b0] sm:$0xff]  ;;  %v219_v3 = vld [vmem:[%s1497_s1 + $0x3d8] sm:$0xff] }
  0x44   :  { %311 = vmatmul.mubr.f32.vlgmr.msra.gmra.mrb[0].mxu0 %v1002_v48  ;;  %v175_v48 = vld [vmem:[%s1497_s1 + $0x278] sm:$0xff]  ;;  %v217_v2 = vld [vmem:[%s1497_s1 + $0x3c8] sm:$0xff]  ;;  %v218_v7 = vld [vmem:[%s1497_s1 + $0x3d0] sm:$0xff] }
  0x45   :  { %725 = vmatpush1.bf16.msra.mxu0 %v724_v41  ;;  %381 = vmatprep.mubr.f32.mxu0 %v241_v18  ;;  %v734_v34 = vpack.c.bf16 %v175_v48, %v173_v29  ;;  %v754_v41 = vpack.c.bf16 %v195_v13, %v193_v42  ;;  %v192_v18 = vld [vmem:[%s1497_s1 + $0x300] sm:$0xff]  ;;  %v198_v29 = vld [vmem:[%s1497_s1 + $0x330] sm:$0xff]  ;;  %v201_v48 = vld [vmem:[%s1497_s1 + $0x348] sm:$0xff]  ;;  %v778_v5 = vpack.c.bf16 %v219_v3, %v217_v2  ;;  %v886_v2 = vmov 0.0  }
  0x46   :  { %727 = vmatprep.subr.bf16.mxu0 %v726_v19  ;;  %v194_v19 = vld [vmem:[%s1497_s1 + $0x310] sm:$0xff]  ;;  %797 = vmatpush1.bf16.msra.mxu1 %v796_v14  ;;  %v762_v37 = vpack.c.bf16 %v203_v32, %v201_v48  ;;  %v221_v8 = vld [vmem:[%s1497_s1 + $0x3e8] sm:$0xff]  ;;  %v220_v42 = vld [vmem:[%s1497_s1 + $0x3e0] sm:$0xff] }
  0x47   :  { %v756_v24 = vpack.c.bf16 %v194_v19, %v192_v18  ;;  %798 = vmatprep.subr.bf16.mxu1 %v884_v55  ;;  %v222_v13 = vld [vmem:[%s1497_s1 + $0x3f0] sm:$0xff]  ;;  %v615_v35 = vld [vmem:[%s1499_s3 + $0x1] ss:$8 sm:$0x3]  ;;  %v519_v58 = vld [vmem:[%s1498_s2 + $0xf8] sm:$0xff] }
  0x48   :  { %v784_v14 = vpack.c.bf16 %v222_v13, %v220_v42  ;;  %v434_v32 = vld [vmem:[%s1498_s2 + $0xb0] sm:$0xff]  ;;  %v436_v3 = vld [vmem:[%s1499_s3 + $0x2] ss:$0 sm:$0xff] }
  0x49   :  { %729 = vmatpush1.bf16.msra.mxu0 %v728_v25  ;;  %v422_v25 = vld [vmem:[%s1498_s2 + $0x50] sm:$0xff] }
  0x4a   :  { %731 = vmatprep.subr.bf16.mxu0 %v730_v26  ;;  %v423_v26 = vld [vmem:[%s1498_s2 + $0x58] sm:$0xff]  ;;  %800 = vmatpush1.bf16.msra.mxu1 %v799_v23  ;;  %v428_v23 = vld [vmem:[%s1498_s2 + $0x80] sm:$0xff]  ;;  %v514_v22 = vld [vmem:[%s1498_s2 + $0xd0] sm:$0xff] }
  0x4b   :  { %801 = vmatprep.subr.bf16.mxu1 %v884_v55 }
  0x4d   :  { %733 = vmatpush1.bf16.msra.mxu0 %v732_v33  ;;  %v802_v33 = vpack.c.bf16 %v423_v26, %v422_v25  ;;  %v430_v25 = vld [vmem:[%s1498_s2 + $0x90] sm:$0xff]  ;;  %v431_v26 = vld [vmem:[%s1498_s2 + $0x98] sm:$0xff] }
  0x4e   :  { %735 = vmatprep.subr.bf16.mxu0 %v734_v34  ;;  %v760_v34 = vpack.c.bf16 %v198_v29, %v196_v28  ;;  %v432_v28 = vld [vmem:[%s1498_s2 + $0xa0] sm:$0xff]  ;;  %v433_v29 = vld [vmem:[%s1498_s2 + $0xa8] sm:$0xff] }
  0x4f   :  { %803 = vmatpush1.bf16.msra.mxu1 %v802_v33  ;;  %v817_v48 = vpack.c.bf16 %v433_v29, %v432_v28  ;;  %v435_v33 = vld [vmem:[%s1498_s2 + $0xb8] sm:$0xff] }
  0x50   :  { %804 = vmatprep.subr.bf16.mxu1 %v884_v55 }
  0x51   :  { %737 = vmatpush1.bf16.msra.mxu0 %v736_v39  ;;  %v202_v39 = vld [vmem:[%s1497_s1 + $0x350] sm:$0xff] }
  0x52   :  { %739 = vmatprep.subr.bf16.mxu0 %v738_v40  ;;  %v205_v40 = vld [vmem:[%s1497_s1 + $0x368] sm:$0xff]  ;;  %v764_v45 = vpack.c.bf16 %v202_v39, %v200_v38  ;;  %v405_v39 = vrot.slane %v615_v35, %v28_v31  ;;  %v515_v31 = vld [vmem:[%s1498_s2 + $0xd8] sm:$0xff] }
  0x53   :  { %v766_v49 = vpack.c.bf16 %v207_v43, %v205_v40  ;;  %806 = vmatpush1.bf16.msra.mxu1 %v805_v44 }
  0x54   :  { %807 = vmatprep.subr.bf16.mxu1 %v884_v55 }
  0x55   :  { %741 = vmatpush1.bf16.msra.mxu0 %v740_v47  ;;  %v427_v47 = vld [vmem:[%s1498_s2 + $0x78] sm:$0xff] }
  0x56   :  { %743 = vmatprep.subr.bf16.mxu0 %v742_v52  ;;  %v209_v52 = vld [vmem:[%s1497_s1 + $0x388] sm:$0xff]  ;;  %v808_v54 = vpack.c.bf16 %v427_v47, %v426_v46  ;;  %v512_v47 = vld [vmem:[%s1498_s2 + $0xc0] sm:$0xff] }
  0x57   :  { %v770_v57 = vpack.c.bf16 %v211_v53, %v209_v52  ;;  %v826_v52 = vpack.c.bf16 %v515_v31, %v514_v22  ;;  %v516_v53 = vld [vmem:[%s1498_s2 + $0xe0] sm:$0xff] }
  0x58   :  { %809 = vmatpush1.bf16.msra.mxu1 %v808_v54  ;;  %v517_v54 = vld [vmem:[%s1498_s2 + $0xe8] sm:$0xff] }
  0x59   :  { %745 = vmatpush1.bf16.msra.mxu0 %v744_v61  ;;  %v215_v61 = vld [vmem:[%s1497_s1 + $0x3b8] sm:$0xff]  ;;  %810 = vmatprep.subr.bf16.mxu1 %v884_v55 }
  0x5a   :  { %747 = vmatprep.subr.bf16.mxu0 %v746_v0  ;;  %v774_v63 = vpack.c.bf16 %v215_v61, %v213_v60  ;;  %v212_v0 = vld [vmem:[%s1497_s1 + $0x3a0] sm:$0xff]  ;;  %v521_v61 = vld [vmem:[%s1498_s2 + $0x108] sm:$0xff] }
  0x5b   :  { %v776_v4 = vpack.c.bf16 %v214_v1, %v212_v0  ;;  %v520_v60 = vld [vmem:[%s1498_s2 + $0x100] sm:$0xff]  ;;  %v523_v0 = vld [vmem:[%s1498_s2 + $0x118] sm:$0xff] }
  0x5d   :  { %749 = vmatpush1.bf16.msra.mxu0 %v748_v6  ;;  %v216_v6 = vld [vmem:[%s1497_s1 + $0x3c0] sm:$0xff] }
  0x5e   :  { %751 = vmatprep.subr.bf16.mxu0 %v750_v9  ;;  %v223_v9 = vld [vmem:[%s1497_s1 + $0x3f8] sm:$0xff]  ;;  %v780_v10 = vpack.c.bf16 %v218_v7, %v216_v6  ;;  %v524_v7 = vld [vmem:[%s1499_s3 + $0x3] ss:$0 sm:$0xff] }
  0x5f   :  { %v782_v11 = vpack.c.bf16 %v223_v9, %v221_v8 }
  0x61   :  { %753 = vmatpush1.bf16.msra.mxu0 %v752_v15  ;;  %v20_v15 = vld [vmem:[%s1499_s3 + $0x4] ss:$0 sm:$0xff] }
  0x62   :  { %755 = vmatprep.subr.bf16.mxu0 %v754_v41 }
  0x65   :  { %757 = vmatpush1.bf16.msra.mxu0 %v756_v24 }
  0x66   :  { %759 = vmatprep.subr.bf16.mxu0 %v758_v27  ;;  %v814_v27 = vpack.c.bf16 %v431_v26, %v430_v25 }
  0x69   :  { %761 = vmatpush1.bf16.msra.mxu0 %v760_v34  ;;  %v820_v34 = vpack.c.bf16 %v435_v33, %v434_v32 }
  0x6a   :  { %763 = vmatprep.subr.bf16.mxu0 %v762_v37  ;;  %v401_v37 = vrot.slane %v615_v35, %v24_v30 }
  0x6d   :  { %765 = vmatpush1.bf16.msra.mxu0 %v764_v45 }
  0x6e   :  { %767 = vmatprep.subr.bf16.mxu0 %v766_v49  ;;  %v513_v49 = vld [vmem:[%s1498_s2 + $0xc8] sm:$0xff] }
  0x6f   :  { %v823_v30 = vpack.c.bf16 %v513_v49, %v512_v47 }
  0x71   :  { %769 = vmatpush1.bf16.msra.mxu0 %v768_v56  ;;  %v829_v56 = vpack.c.bf16 %v517_v54, %v516_v53 }
  0x72   :  { %771 = vmatprep.subr.bf16.mxu0 %v770_v57  ;;  %v518_v57 = vld [vmem:[%s1498_s2 + $0xf0] sm:$0xff] }
  0x73   :  { %v832_v59 = vpack.c.bf16 %v519_v58, %v518_v57 }
  0x75   :  { %773 = vmatpush1.bf16.msra.mxu0 %v772_v62  ;;  %v835_v62 = vpack.c.bf16 %v521_v61, %v520_v60 }
  0x76   :  { %775 = vmatprep.subr.bf16.mxu0 %v774_v63  ;;  %v522_v63 = vld [vmem:[%s1498_s2 + $0x110] sm:$0xff] }
  0x77   :  { %v838_v1 = vpack.c.bf16 %v523_v0, %v522_v63 }
  0x79   :  { %777 = vmatpush1.bf16.msra.mxu0 %v776_v4 }
  0x7a   :  { %779 = vmatprep.subr.bf16.mxu0 %v778_v5 }
  0x7d   :  { %781 = vmatpush1.bf16.msra.mxu0 %v780_v10 }
  0x7e   :  { %783 = vmatprep.subr.bf16.mxu0 %v782_v11 }
  0x81   :  { %785 = vmatpush1.bf16.msra.mxu0 %v784_v14 }
  0x84   :  { %382 = vmatmul.mubr.f32.vlgmr.msra.gmra.mrb[0].mxu0 %v1150_v12  ;;  %v429_v12 = vld [vmem:[%s1498_s2 + $0x88] sm:$0xff]  ;;  %s887_s2 = smov [#allocation2]  }
  0x85   :  { %v811_v24 = vpack.c.bf16 %v429_v12, %v428_v23  ;;  %s607_s30 = sshll.u32 %s887_s2, 4  ;;  %s608_s30 = int_to_ptr.vmem [resolvable:$true] %s607_s30 }
  0x86   :  { %s858_s5 = scalar_lea.vmem %s608_s30, 32  ;;  %p863_p1 = scmp.lt.s32.totalorder %s608_s30, %s608_s30 }
  0x87   :  { %812 = vmatpush1.bf16.msra.mxu1 %v811_v24  ;;  %p859_p0 = scmp.ne.s32.totalorder %s608_s30, %s858_s5  ;;  %p864_p2 = scmp.lt.s32.totalorder %s858_s5, %s858_s5 }
  0x88   :  { %813 = vmatprep.subr.bf16.mxu1 %v884_v55 }
  0x89   :  { %p865_p3 = por %p864_p2, %p863_p1 }
  0x8b   :  { %815 = vmatpush1.bf16.msra.mxu1 %v814_v27  ;;  %p866_p4 = pnand %p865_p3, %p859_p0 }
  0x8c   :  { %816 = vmatprep.subr.bf16.mxu1 %v884_v55 }
  0x8f   :  { %818 = vmatpush1.bf16.msra.mxu1 %v817_v48 }
  0x90   :  { %819 = vmatprep.subr.bf16.mxu1 %v884_v55 }
  0x93   :  { %821 = vmatpush1.bf16.msra.mxu1 %v820_v34 }
  0x94   :  { %822 = vmatprep.subr.bf16.mxu1 %v884_v55 }
  0xac   :  { %v88_v16 = vpop.xlane.xlu0 %87 }
  0xad   :  { %v89_v17 = vadd.f32 %v88_v16, %v20_v15 }
  0xaf   :  { %v90_v41 = vsub.f32 0.0, %v89_v17 }
  0xb1   :  { %v91_v18 = vmul.f32 1.442695, %v90_v41 }
  0xb3   :  { %850 = vpow2.f32 %v91_v18 }
  0xbd   :  { %v851_v19 = vpop.eup %850 }
  0xbe   :  { %v93_v20 = vadd.f32 1.0, %v851_v19 }
  0xc0   :  { %852 = vrcp.f32 %v93_v20 }
  0xca   :  { %v853_v21 = vpop.eup %852 }
  0xcb   :  { %392 = vperm.xlu0 %848, %v853_v21  }
 0x14a   :  { %v393_v36 = vpop.permute.xlu0 %392 }
 0x157   :  { %v383_v38 = vpop.f32.mrb[0].mxu0 }
 0x158   :  { %v395_v40 = vmul.f32 %v393_v36, %v383_v38  ;;  %v385_v43 = vpop.f32.mrb[1].mxu0 }
 0x159   :  { %v396_v44 = vmul.f32 %v393_v36, %v385_v43 }
 0x15a   :  { %v408_v45 = vadd.f32 %v401_v37, %v395_v40 }
 0x15b   :  { %v409_v46 = vadd.f32 %v405_v39, %v396_v44 }
 0x15d   :  { %854 = vtanh.f32 %v409_v46 }
 0x15e   :  { %856 = vtanh.f32 %v408_v45 }
 0x167   :  { %v855_v50 = vpop.eup %854 }
 0x168   :  { %v857_v51 = vpop.eup %856  ;;  %616 = vmatprep.mubr.msk.f32.mxu1 %vm437_vm1, %v855_v50 }
 0x169   :  { %506 = vmatmul.mubr.f32.vlgmr.msra.gmra.mrb[0].mxu1 %v857_v51 }
 0x16a   :  { %824 = vmatpush3.bf16.msra.mxu1 %v823_v30  ;;  %655 = vmatprep.mubr.msk.f32.mxu1 %vm885_vm2, %v886_v2 }
 0x16b   :  { %825 = vmatprep.subr.bf16.mxu1 %v884_v55 }
 0x16e   :  { %827 = vmatpush3.bf16.msra.mxu1 %v826_v52 }
 0x16f   :  { %828 = vmatprep.subr.bf16.mxu1 %v884_v55 }
 0x172   :  { %830 = vmatpush3.bf16.msra.mxu1 %v829_v56 }
 0x173   :  { %831 = vmatprep.subr.bf16.mxu1 %v884_v55 }
 0x176   :  { %833 = vmatpush3.bf16.msra.mxu1 %v832_v59 }
 0x177   :  { %834 = vmatprep.subr.bf16.mxu1 %v884_v55 }
 0x17a   :  { %836 = vmatpush3.bf16.msra.mxu1 %v835_v62 }
 0x17b   :  { %837 = vmatprep.subr.bf16.mxu1 %v884_v55 }
 0x17e   :  { %839 = vmatpush3.bf16.msra.mxu1 %v838_v1 }
 0x23c   :  { %v507_v4 = vpop.f32.mrb[0].mxu1 }
 0x23d   :  { %v508_v5 = vadd.f32 %v507_v4, %v436_v3  ;;  %v509_v55 = vpop.f32.mrb[1].mxu1 }
 0x23f   :  { %v511_v6 = vmax.f32 %v508_v5, 0.0 }
 0x241   :  { %656 = vmatmul.mubr.msk.f32.vlgmr.msra.gmra.mrb[2].mxu1 %vm525_vm3, %v511_v6 }
 0x314   :  { %v595_v8 = vpop.f32.mrb[2].mxu1 }
 0x315   :  { %v596_v9 = vadd.f32 %v595_v8, %v524_v7  ;;  %v657_v10 = vpop.f32.mrb[3].mxu1 }
 0x317   :  { %600 = vst.msk [vmem:[#allocation2] sm:$0x3] %vm599_vm4, %v596_v9 }
 0x318   :  { %869 = shalt.err (!%p866_p4)
}
 0x319   :  { %s870_s8 = scalar_lea.hbm %s1500_s4, 32 }
 0x31a   :  { %p871_p5 = scmp.ne.s32.totalorder %s1500_s4, %s870_s8  ;;  %p874_p6 = scmp.lt.u32.totalorder %s870_s8, %s1500_s4 }
 0x31c   :  { %p876_p7 = pnand %p874_p6, %p871_p5 }
 0x31e   :  { %879 = shalt.err (!%p876_p7)
}
 0x31f   :  { %610 = dma.vmem_to_hbm [thread:$0]  %s608_s30, 32, %s1500_s4, [#allocation3]  }
 0x320   :  { %880 = dma.done.wait [#allocation3], 32  }
 0x321   :  { %881 = vsyncadd [#allocation3], 4294967264 }
 0x322   :  { %614 = vsyncpa [#allocation3], 1 }

</bundles_post_ra>
